<compile_context>
chip_gen: v7x
topology: tpu7x:2x2x1
jax: 0.10.0
libtpu: 0.0.40
codegen_flags: <defaults>
</compile_context>

<pallas_src>
import functools

import numpy as np

import jax
import jax.numpy as jnp
from jax.experimental import pallas as pl
from jax.experimental.pallas import tpu as pltpu


# --------------------------------------------------------------- model config
C_IN = 4
C1, C2 = 16, 32            # stand-in arch "C3-16-2,C3-32-2"
D_FEAT = C2
HIDDEN = 1024
NUM_ID = 10

_VMEM_LIMIT = 32 * 1024 * 1024   # per-step footprint here is ~1 MiB; safe on v5e/v6e/v7x


# ----------------------------------------------------------- banded conv prep
def _banded_conv_weight(w, w_in):
    """[3,3,Ci,Co] conv weight -> [3, w_in*Ci, (w_in//2)*Co] banded weight.

    Row index = (input col, ci), col index = (output col j, co);
    W_kh[(c,ci),(j,co)] = w[kh, c+1-2j, ci, co] when 0 <= c+1-2j < 3 else 0
    (the +1 accounts for left zero-padding, whose contribution is dropped).
    """
    _, _, ci, co = w.shape
    wo = w_in // 2
    sel = np.zeros((3, w_in + 2, wo), np.float32)
    for k in range(3):
        for j in range(wo):
            sel[k, 2 * j + k, j] = 1.0
    wb = jnp.einsum('kcj,hkdo->hcdjo', jnp.asarray(sel), w)       # [3,w_in+2,Ci,wo,Co]
    wb = wb.reshape(3, (w_in + 2) * ci, wo * co)
    return wb[:, ci:(w_in + 1) * ci, :]                           # drop zero-pad cols


# ------------------------------------------------------------------ the kernel
def _fused_forward_kernel(ae_ref, ao_ref, w1_ref, b1_ref, w2_ref, b2_ref,
                          gwf_ref, bfc_ref, wh_ref, bh_ref, y_ref,
                          real_ref, loss_ref, *, B, Ho2, num_id):
    """conv1 + conv2 + GAP + Linear(D,1024) + heads + cross-entropy, fused.

    ae/ao : [B*Ho2, 3*W*Cin] bf16  conv1 LHS for even / odd output rows
    w1    : [3*W*Cin, Wo1*C1] bf16 banded conv1 weight (kh-stacked along K)
    w2    : [3, Wo1*C1, Wo2*C2] bf16 banded conv2 weights (one per kh)
    gwf   : [Wo2*C2, 1024] bf16    GAP-folded D->1024 projection
    wh/bh : [1024, 1+num_id] bf16 / [1, 1+num_id] f32 (real | id heads)
    y     : [B, 1] int32 labels
    """
    f32 = jnp.float32
    bf16 = jnp.bfloat16

    # ---- conv1: one banded matmul per output-row parity (N = 128 lanes) ----
    w1 = w1_ref[...]
    b1 = b1_ref[...].astype(f32)
    h_e = jnp.maximum(jnp.dot(ae_ref[...], w1, preferred_element_type=f32) + b1, 0.0)
    h_o = jnp.maximum(jnp.dot(ao_ref[...], w1, preferred_element_type=f32) + b1, 0.0)
    # h_e rows = h1 rows 0,2,4,... ; h_o rows = h1 rows 1,3,5,...   [B*Ho2, Wo1*C1]

    # ---- conv2: 3 banded matmuls (kh = 0,1,2), K = Wo1*C1 = 128 ------------
    K2 = h_e.shape[-1]
    # padded h1 row 2*i2 (kh=0) is h1 row 2*i2-1: zero row for i2=0, else h_o[i2-1]
    l0 = jnp.concatenate(
        [jnp.zeros((B, 1, K2), f32), h_o.reshape(B, Ho2, K2)[:, :Ho2 - 1, :]],
        axis=1).reshape(B * Ho2, K2)
    acc = jnp.dot(l0.astype(bf16), w2_ref[0], preferred_element_type=f32)
    acc += jnp.dot(h_e.astype(bf16), w2_ref[1], preferred_element_type=f32)   # rows 2i2+1
    acc += jnp.dot(h_o.astype(bf16), w2_ref[2], preferred_element_type=f32)   # rows 2i2+2
    h2 = jnp.maximum(acc + b2_ref[...].astype(f32), 0.0)        # [B*Ho2, Wo2*C2]

    # ---- GAP (scale folded into gwf) + Linear(D,1024) + heads --------------
    g = jnp.sum(h2.reshape(B, Ho2, h2.shape[-1]), axis=1)       # [B, Wo2*C2]
    vecs = jnp.dot(g.astype(bf16), gwf_ref[...],
                   preferred_element_type=f32) + bfc_ref[...]   # [B, 1024]
    heads = jnp.dot(vecs.astype(bf16), wh_ref[...],
                    preferred_element_type=f32) + bh_ref[...]   # [B, 1+num_id]
    real_ref[...] = heads[:, 0:1].astype(real_ref.dtype)

    # ---- cross entropy: per-block partial sum (mean taken in the wrapper) --
    logits = heads[:, 1:1 + num_id]
    m = jnp.max(logits, axis=-1, keepdims=True)
    lse = m + jnp.log(jnp.sum(jnp.exp(logits - m), axis=-1, keepdims=True))
    cls = jax.lax.broadcasted_iota(jnp.int32, logits.shape, 1)
    tgt = jnp.sum(jnp.where(cls == y_ref[...], logits, 0.0),
                  axis=-1, keepdims=True)                       # [B, 1]
    loss_ref[...] = jnp.sum(lse - tgt, axis=0, keepdims=True).astype(loss_ref.dtype)


# --------------------------------------------------------------- params
def init_params(key):
    ks = jax.random.split(key, 10)

    def uni(k, shape, fan_in):
        s = 1.0 / jnp.sqrt(jnp.float32(fan_in))
        return jax.random.uniform(k, shape, jnp.float32, -s, s)

    return {
        'w1': uni(ks[0], (3, 3, C_IN, C1), 9 * C_IN),
        'b1': uni(ks[1], (C1,), 9 * C_IN),
        'w2': uni(ks[2], (3, 3, C1, C2), 9 * C1),
        'b2': uni(ks[3], (C2,), 9 * C1),
        'wf': uni(ks[4], (D_FEAT, HIDDEN), D_FEAT),
        'bf': uni(ks[5], (HIDDEN,), D_FEAT),
        'wr': uni(ks[6], (HIDDEN, 1), HIDDEN),
        'br': uni(ks[7], (1,), HIDDEN),
        'wi': uni(ks[8], (HIDDEN, NUM_ID), HIDDEN),
        'bi': uni(ks[9], (NUM_ID,), HIDDEN),
    }


# --------------------------------------------------------------- forward pass
def ac_discriminator_forward(x, y, params):
    """x: [N,C,H,W] (or [N,H,W]) f32, y: [N] int -> (real_scores [N,1], ac_loss scalar)."""
    if x.ndim == 3:
        x = x[:, None]                                          # x[:, None] as in torch
    N, Cin, H, W = x.shape
    assert H % 4 == 0 and W % 4 == 0, "spatial dims must be multiples of 4"
    Ho1, Wo1 = H // 2, W // 2
    Ho2, Wo2 = Ho1 // 2, Wo1 // 2
    c1 = params['w1'].shape[3]
    c2 = params['w2'].shape[3]
    num_id = params['wi'].shape[1]

    B = N if N <= 8 else 8                                      # images per grid step
    assert N % B == 0
    nb = N // B

    xt = jnp.transpose(x, (0, 2, 3, 1)).astype(jnp.float32)     # NCHW -> NHWC
    # row-pad only; column zero-padding is folded into the banded weights
    xp = jnp.pad(xt, ((0, 0), (1, 1), (0, 0), (0, 0)))          # [N, H+2, W, Cin]
    xrows = xp.reshape(N, H + 2, W * Cin).astype(jnp.bfloat16)  # rows flattened (col,ci)

    # conv1 LHS: row (b,i') holds padded rows 4i'+kh (even outputs) or
    # 4i'+2+kh (odd outputs), kh=0..2 concatenated along K.
    idx = np.arange(Ho2)[:, None] * 4 + np.arange(3)[None, :]   # [Ho2, 3]
    a_even = xrows[:, idx.reshape(-1), :].reshape(N * Ho2, 3 * W * Cin)
    a_odd = xrows[:, (idx + 2).reshape(-1), :].reshape(N * Ho2, 3 * W * Cin)

    # banded conv weights + lane-replicated biases
    w1c = _banded_conv_weight(params['w1'], W)                  # [3, W*Cin, Wo1*c1]
    w1c = w1c.reshape(3 * W * Cin, Wo1 * c1).astype(jnp.bfloat16)
    w2c = _banded_conv_weight(params['w2'], Wo1).astype(jnp.bfloat16)  # [3, Wo1*c1, Wo2*c2]
    b1r = jnp.tile(params['b1'].reshape(1, c1), (1, Wo1))       # [1, Wo1*c1] f32
    b2r = jnp.tile(params['b2'].reshape(1, c2), (1, Wo2))       # [1, Wo2*c2] f32

    # GAP (mean over Ho2*Wo2 positions) folded into the D->1024 projection
    gwf = (jnp.tile(params['wf'], (Wo2, 1)) / float(Ho2 * Wo2)).astype(jnp.bfloat16)
    bfc = params['bf'].reshape(1, HIDDEN)
    w_heads = jnp.concatenate([params['wr'], params['wi']], axis=1).astype(jnp.bfloat16)
    b_heads = jnp.concatenate([params['br'].reshape(1, 1),
                               params['bi'].reshape(1, num_id)], axis=1)
    y2 = y.astype(jnp.int32).reshape(N, 1)

    kernel = functools.partial(_fused_forward_kernel, B=B, Ho2=Ho2, num_id=num_id)
    real_scores, loss_parts = pl.pallas_call(
        kernel,
        out_shape=(jax.ShapeDtypeStruct((N, 1), jnp.float32),
                   jax.ShapeDtypeStruct((nb, 1), jnp.float32)),
        grid=(nb,),
        in_specs=[
            pl.BlockSpec((B * Ho2, 3 * W * Cin), lambda n: (n, 0)),
            pl.BlockSpec((B * Ho2, 3 * W * Cin), lambda n: (n, 0)),
            pl.BlockSpec(w1c.shape, lambda n: (0, 0)),
            pl.BlockSpec(b1r.shape, lambda n: (0, 0)),
            pl.BlockSpec(w2c.shape, lambda n: (0, 0, 0)),
            pl.BlockSpec(b2r.shape, lambda n: (0, 0)),
            pl.BlockSpec(gwf.shape, lambda n: (0, 0)),
            pl.BlockSpec(bfc.shape, lambda n: (0, 0)),
            pl.BlockSpec(w_heads.shape, lambda n: (0, 0)),
            pl.BlockSpec(b_heads.shape, lambda n: (0, 0)),
            pl.BlockSpec((B, 1), lambda n: (n, 0)),
        ],
        out_specs=[pl.BlockSpec((B, 1), lambda n: (n, 0)),
                   pl.BlockSpec((1, 1), lambda n: (n, 0))],
        compiler_params=pltpu.CompilerParams(
            dimension_semantics=("parallel",),
            vmem_limit_bytes=_VMEM_LIMIT),
    )(a_even, a_odd, w1c, b1r, w2c, b2r, gwf, bfc, w_heads, b_heads, y2)

    ac_loss = jnp.sum(loss_parts) / N
    return real_scores, ac_loss


# --------------------------------------------------------- pure-JAX reference
def _reference_forward(x, y, params):
    if x.ndim == 3:
        x = x[:, None]
    xt = jnp.transpose(x, (0, 2, 3, 1)).astype(jnp.float32)

    def conv(h, w, b):
        out = jax.lax.conv_general_dilated(
            h, w, window_strides=(2, 2), padding=((1, 1), (1, 1)),
            dimension_numbers=('NHWC', 'HWIO', 'NHWC'))
        return jax.nn.relu(out + b)

    h = conv(xt, params['w1'], params['b1'])
    h = conv(h, params['w2'], params['b2'])
    g = jnp.mean(h, axis=(1, 2))
    vecs = g @ params['wf'] + params['bf']
    real = vecs @ params['wr'] + params['br']
    logits = vecs @ params['wi'] + params['bi']
    lse = jax.scipy.special.logsumexp(logits, axis=-1)
    tgt = jnp.take_along_axis(logits, y[:, None].astype(jnp.int32), axis=-1)[:, 0]
    return real, jnp.mean(lse - tgt)


# --------------------------------------------------------------------- main
if __name__ == "__main__":
    key = jax.random.PRNGKey(0)
    k_p, k_x, k_y = jax.random.split(key, 3)

    params = init_params(k_p)
    x = jax.random.normal(k_x, (2, C_IN, 16, 16), jnp.float32)   # NCHW input
    y = jax.random.randint(k_y, (2,), 0, NUM_ID, jnp.int32)

    real_scores, ac_loss = jax.jit(ac_discriminator_forward)(x, y, params)
    jax.block_until_ready((real_scores, ac_loss))

    assert real_scores.shape == (2, 1)
    assert ac_loss.shape == ()

    # loose-tolerance check vs. f32 reference (MXU operands are bf16)
    ref_real, ref_loss = jax.jit(_reference_forward)(x, y, params)
    assert float(jnp.max(jnp.abs(real_scores - ref_real))) < 0.1
    assert float(jnp.abs(ac_loss - ref_loss)) < 0.1

    print("KERNEL_OK")
</pallas_src>

<mosaic_0001>
module attributes {stable_mosaic.version = 11 : i64} {
  func.func @_fused_forward_kernel(%arg0: i32, %arg1: memref<8x192xbf16, #tpu.memory_space<vmem>>, %arg2: memref<8x192xbf16, #tpu.memory_space<vmem>>, %arg3: memref<192x128xbf16, #tpu.memory_space<vmem>>, %arg4: memref<1x128xf32, #tpu.memory_space<vmem>>, %arg5: memref<3x128x128xbf16, #tpu.memory_space<vmem>>, %arg6: memref<1x128xf32, #tpu.memory_space<vmem>>, %arg7: memref<128x1024xbf16, #tpu.memory_space<vmem>>, %arg8: memref<1x1024xf32, #tpu.memory_space<vmem>>, %arg9: memref<1024x11xbf16, #tpu.memory_space<vmem>>, %arg10: memref<1x11xf32, #tpu.memory_space<vmem>>, %arg11: memref<2x1xi32, #tpu.memory_space<vmem>>, %arg12: memref<2x1xf32, #tpu.memory_space<vmem>>, %arg13: memref<1x1xf32, #tpu.memory_space<vmem>>) attributes {dimension_semantics = [#tpu.dimension_semantics<parallel>], iteration_bounds = array<i64: 1>, scalar_prefetch = 0 : i64, scratch_operands = 0 : i64, tpu.core_type = #tpu.core_type<tc>, window_params = [{transform_indices = @transform_0, window_bounds = array<i64: 8, 192>}, {transform_indices = @transform_1, window_bounds = array<i64: 8, 192>}, {pipeline_mode = #tpu.pipeline_mode<synchronous>, transform_indices = @transform_2, window_bounds = array<i64: 192, 128>}, {pipeline_mode = #tpu.pipeline_mode<synchronous>, transform_indices = @transform_3, window_bounds = array<i64: 1, 128>}, {pipeline_mode = #tpu.pipeline_mode<synchronous>, transform_indices = @transform_4, window_bounds = array<i64: 3, 128, 128>}, {pipeline_mode = #tpu.pipeline_mode<synchronous>, transform_indices = @transform_5, window_bounds = array<i64: 1, 128>}, {pipeline_mode = #tpu.pipeline_mode<synchronous>, transform_indices = @transform_6, window_bounds = array<i64: 128, 1024>}, {pipeline_mode = #tpu.pipeline_mode<synchronous>, transform_indices = @transform_7, window_bounds = array<i64: 1, 1024>}, {pipeline_mode = #tpu.pipeline_mode<synchronous>, transform_indices = @transform_8, window_bounds = array<i64: 1024, 11>}, {pipeline_mode = #tpu.pipeline_mode<synchronous>, transform_indices = @transform_9, window_bounds = array<i64: 1, 11>}, {transform_indices = @transform_10, window_bounds = array<i64: 2, 1>}, {transform_indices = @transform_11, window_bounds = array<i64: 2, 1>}, {transform_indices = @transform_12, window_bounds = array<i64: 1, 1>}]} {
    %c0 = arith.constant 0 : index
    %c0_0 = arith.constant 0 : index
    %0 = vector.load %arg3[%c0, %c0_0] : memref<192x128xbf16, #tpu.memory_space<vmem>>, vector<192x128xbf16>
    %c0_1 = arith.constant 0 : index
    %c0_2 = arith.constant 0 : index
    %1 = vector.load %arg4[%c0_1, %c0_2] : memref<1x128xf32, #tpu.memory_space<vmem>>, vector<1x128xf32>
    %c0_3 = arith.constant 0 : index
    %c0_4 = arith.constant 0 : index
    %2 = vector.load %arg1[%c0_3, %c0_4] : memref<8x192xbf16, #tpu.memory_space<vmem>>, vector<8x192xbf16>
    %cst = arith.constant dense<0.000000e+00> : vector<8x128xf32>
    %3 = tpu.matmul %2, %0, %cst {dimension_numbers = #tpu.dot_dimension_numbers<[1], [0], [0], [1], [0, 0, 1, 1], [], []>} : vector<8x192xbf16>, vector<192x128xbf16>, vector<8x128xf32> -> vector<8x128xf32>
    %4 = vector.broadcast %1 : vector<1x128xf32> to vector<8x128xf32>
    %5 = arith.addf %3, %4 : vector<8x128xf32>
    %cst_5 = arith.constant 0.000000e+00 : f32
    %6 = vector.broadcast %cst_5 : f32 to vector<8x128xf32>
    %7 = arith.maximumf %5, %6 : vector<8x128xf32>
    %c0_6 = arith.constant 0 : index
    %c0_7 = arith.constant 0 : index
    %8 = vector.load %arg2[%c0_6, %c0_7] : memref<8x192xbf16, #tpu.memory_space<vmem>>, vector<8x192xbf16>
    %cst_8 = arith.constant dense<0.000000e+00> : vector<8x128xf32>
    %9 = tpu.matmul %8, %0, %cst_8 {dimension_numbers = #tpu.dot_dimension_numbers<[1], [0], [0], [1], [0, 0, 1, 1], [], []>} : vector<8x192xbf16>, vector<192x128xbf16>, vector<8x128xf32> -> vector<8x128xf32>
    %10 = vector.broadcast %1 : vector<1x128xf32> to vector<8x128xf32>
    %11 = arith.addf %9, %10 : vector<8x128xf32>
    %cst_9 = arith.constant 0.000000e+00 : f32
    %12 = vector.broadcast %cst_9 : f32 to vector<8x128xf32>
    %13 = arith.maximumf %11, %12 : vector<8x128xf32>
    %cst_10 = arith.constant 0.000000e+00 : f32
    %14 = vector.broadcast %cst_10 : f32 to vector<2x1x128xf32>
    %15 = vector.shape_cast %13 : vector<8x128xf32> to vector<2x4x128xf32>
    %16 = vector.extract_strided_slice %15 {offsets = [0, 0, 0], sizes = [2, 3, 128], strides = [1, 1, 1]} : vector<2x4x128xf32> to vector<2x3x128xf32>
    %17 = tpu.concatenate %14, %16 in 1 : vector<2x1x128xf32>, vector<2x3x128xf32> -> vector<2x4x128xf32>
    %18 = vector.shape_cast %17 : vector<2x4x128xf32> to vector<8x128xf32>
    %19 = arith.truncf %18 : vector<8x128xf32> to vector<8x128xbf16>
    %c0_11 = arith.constant 0 : index
    %c0_12 = arith.constant 0 : index
    %c0_13 = arith.constant 0 : index
    %20 = vector.load %arg5[%c0_11, %c0_12, %c0_13] : memref<3x128x128xbf16, #tpu.memory_space<vmem>>, vector<1x128x128xbf16>
    %21 = vector.shape_cast %20 : vector<1x128x128xbf16> to vector<128x128xbf16>
    %cst_14 = arith.constant dense<0.000000e+00> : vector<8x128xf32>
    %22 = tpu.matmul %19, %21, %cst_14 {dimension_numbers = #tpu.dot_dimension_numbers<[1], [0], [0], [1], [0, 0, 1, 1], [], []>} : vector<8x128xbf16>, vector<128x128xbf16>, vector<8x128xf32> -> vector<8x128xf32>
    %23 = arith.truncf %7 : vector<8x128xf32> to vector<8x128xbf16>
    %c1 = arith.constant 1 : index
    %c0_15 = arith.constant 0 : index
    %c0_16 = arith.constant 0 : index
    %24 = vector.load %arg5[%c1, %c0_15, %c0_16] : memref<3x128x128xbf16, #tpu.memory_space<vmem>>, vector<1x128x128xbf16>
    %25 = vector.shape_cast %24 : vector<1x128x128xbf16> to vector<128x128xbf16>
    %cst_17 = arith.constant dense<0.000000e+00> : vector<8x128xf32>
    %26 = tpu.matmul %23, %25, %cst_17 {dimension_numbers = #tpu.dot_dimension_numbers<[1], [0], [0], [1], [0, 0, 1, 1], [], []>} : vector<8x128xbf16>, vector<128x128xbf16>, vector<8x128xf32> -> vector<8x128xf32>
    %27 = arith.addf %22, %26 : vector<8x128xf32>
    %28 = arith.truncf %13 : vector<8x128xf32> to vector<8x128xbf16>
    %c2 = arith.constant 2 : index
    %c0_18 = arith.constant 0 : index
    %c0_19 = arith.constant 0 : index
    %29 = vector.load %arg5[%c2, %c0_18, %c0_19] : memref<3x128x128xbf16, #tpu.memory_space<vmem>>, vector<1x128x128xbf16>
    %30 = vector.shape_cast %29 : vector<1x128x128xbf16> to vector<128x128xbf16>
    %cst_20 = arith.constant dense<0.000000e+00> : vector<8x128xf32>
    %31 = tpu.matmul %28, %30, %cst_20 {dimension_numbers = #tpu.dot_dimension_numbers<[1], [0], [0], [1], [0, 0, 1, 1], [], []>} : vector<8x128xbf16>, vector<128x128xbf16>, vector<8x128xf32> -> vector<8x128xf32>
    %32 = arith.addf %27, %31 : vector<8x128xf32>
    %c0_21 = arith.constant 0 : index
    %c0_22 = arith.constant 0 : index
    %33 = vector.load %arg6[%c0_21, %c0_22] : memref<1x128xf32, #tpu.memory_space<vmem>>, vector<1x128xf32>
    %34 = vector.broadcast %33 : vector<1x128xf32> to vector<8x128xf32>
    %35 = arith.addf %32, %34 : vector<8x128xf32>
    %cst_23 = arith.constant 0.000000e+00 : f32
    %36 = vector.broadcast %cst_23 : f32 to vector<8x128xf32>
    %37 = arith.maximumf %35, %36 : vector<8x128xf32>
    %38 = vector.shape_cast %37 : vector<8x128xf32> to vector<2x4x128xf32>
    %cst_24 = arith.constant dense<0.000000e+00> : vector<2x128xf32>
    %39 = vector.multi_reduction <add>, %38, %cst_24 [1] : vector<2x4x128xf32> to vector<2x128xf32>
    %40 = arith.truncf %39 : vector<2x128xf32> to vector<2x128xbf16>
    %c0_25 = arith.constant 0 : index
    %c0_26 = arith.constant 0 : index
    %41 = vector.load %arg7[%c0_25, %c0_26] : memref<128x1024xbf16, #tpu.memory_space<vmem>>, vector<128x1024xbf16>
    %cst_27 = arith.constant dense<0.000000e+00> : vector<2x1024xf32>
    %42 = tpu.matmul %40, %41, %cst_27 {dimension_numbers = #tpu.dot_dimension_numbers<[1], [0], [0], [1], [0, 0, 1, 1], [], []>} : vector<2x128xbf16>, vector<128x1024xbf16>, vector<2x1024xf32> -> vector<2x1024xf32>
    %c0_28 = arith.constant 0 : index
    %c0_29 = arith.constant 0 : index
    %43 = vector.load %arg8[%c0_28, %c0_29] : memref<1x1024xf32, #tpu.memory_space<vmem>>, vector<1x1024xf32>
    %44 = vector.broadcast %43 : vector<1x1024xf32> to vector<2x1024xf32>
    %45 = arith.addf %42, %44 : vector<2x1024xf32>
    %46 = arith.truncf %45 : vector<2x1024xf32> to vector<2x1024xbf16>
    %c0_30 = arith.constant 0 : index
    %c0_31 = arith.constant 0 : index
    %47 = vector.load %arg9[%c0_30, %c0_31] : memref<1024x11xbf16, #tpu.memory_space<vmem>>, vector<1024x11xbf16>
    %cst_32 = arith.constant dense<0.000000e+00> : vector<2x11xf32>
    %48 = tpu.matmul %46, %47, %cst_32 {dimension_numbers = #tpu.dot_dimension_numbers<[1], [0], [0], [1], [0, 0, 1, 1], [], []>} : vector<2x1024xbf16>, vector<1024x11xbf16>, vector<2x11xf32> -> vector<2x11xf32>
    %c0_33 = arith.constant 0 : index
    %c0_34 = arith.constant 0 : index
    %49 = vector.load %arg10[%c0_33, %c0_34] : memref<1x11xf32, #tpu.memory_space<vmem>>, vector<1x11xf32>
    %50 = vector.broadcast %49 : vector<1x11xf32> to vector<2x11xf32>
    %51 = arith.addf %48, %50 : vector<2x11xf32>
    %52 = vector.extract_strided_slice %51 {offsets = [0, 0], sizes = [2, 1], strides = [1, 1]} : vector<2x11xf32> to vector<2x1xf32>
    %c0_35 = arith.constant 0 : index
    %c0_36 = arith.constant 0 : index
    %53 = vector.load %arg12[%c0_35, %c0_36] : memref<2x1xf32, #tpu.memory_space<vmem>>, vector<2x1xf32>
    tpu.vector_store %arg12[%c0_35, %c0_36], %52 {strides = array<i32>} : memref<2x1xf32, #tpu.memory_space<vmem>>, vector<2x1xf32>,
    %54 = vector.extract_strided_slice %51 {offsets = [0, 1], sizes = [2, 10], strides = [1, 1]} : vector<2x11xf32> to vector<2x10xf32>
    %cst_37 = arith.constant dense<0xFF800000> : vector<2xf32>
    %55 = vector.multi_reduction <maximumf>, %54, %cst_37 [1] : vector<2x10xf32> to vector<2xf32>
    %56 = vector.shape_cast %55 : vector<2xf32> to vector<2x1xf32>
    %57 = vector.broadcast %56 : vector<2x1xf32> to vector<2x10xf32>
    %58 = arith.subf %54, %57 : vector<2x10xf32>
    %59 = math.exp %58 : vector<2x10xf32>
    %cst_38 = arith.constant dense<0.000000e+00> : vector<2xf32>
    %60 = vector.multi_reduction <add>, %59, %cst_38 [1] : vector<2x10xf32> to vector<2xf32>
    %61 = vector.shape_cast %60 : vector<2xf32> to vector<2x1xf32>
    %62 = math.log %61 : vector<2x1xf32>
    %63 = arith.addf %56, %62 : vector<2x1xf32>
    %64 = tpu.iota {dimensions = array<i32: 1>} : vector<2x10xi32>
    %c0_39 = arith.constant 0 : index
    %c0_40 = arith.constant 0 : index
    %65 = vector.load %arg11[%c0_39, %c0_40] : memref<2x1xi32, #tpu.memory_space<vmem>>, vector<2x1xi32>
    %66 = vector.broadcast %65 : vector<2x1xi32> to vector<2x10xi32>
    %67 = arith.cmpi eq, %64, %66 : vector<2x10xi32>
    %cst_41 = arith.constant 0.000000e+00 : f32
    %68 = vector.broadcast %cst_41 : f32 to vector<2x10xf32>
    %69 = arith.select %67, %54, %68 : vector<2x10xi1>, vector<2x10xf32>
    %cst_42 = arith.constant dense<0.000000e+00> : vector<2xf32>
    %70 = vector.multi_reduction <add>, %69, %cst_42 [1] : vector<2x10xf32> to vector<2xf32>
    %71 = vector.shape_cast %70 : vector<2xf32> to vector<2x1xf32>
    %72 = arith.subf %63, %71 : vector<2x1xf32>
    %cst_43 = arith.constant dense<0.000000e+00> : vector<1xf32>
    %73 = vector.multi_reduction <add>, %72, %cst_43 [0] : vector<2x1xf32> to vector<1xf32>
    %74 = vector.shape_cast %73 : vector<1xf32> to vector<1x1xf32>
    %c0_44 = arith.constant 0 : index
    %c0_45 = arith.constant 0 : index
    %75 = vector.load %arg13[%c0_44, %c0_45] : memref<1x1xf32, #tpu.memory_space<vmem>>, vector<1x1xf32>
    tpu.vector_store %arg13[%c0_44, %c0_45], %74 {strides = array<i32>} : memref<1x1xf32, #tpu.memory_space<vmem>>, vector<1x1xf32>,
    return
  }
  func.func @transform_0(%arg0: i32) -> (i32, i32) {
    %c0_i32 = arith.constant 0 : i32
    %c0_i32_0 = arith.constant 0 : i32
    return %arg0, %c0_i32 : i32, i32
  }
  func.func @transform_1(%arg0: i32) -> (i32, i32) {
    %c0_i32 = arith.constant 0 : i32
    %c0_i32_0 = arith.constant 0 : i32
    return %arg0, %c0_i32 : i32, i32
  }
  func.func @transform_2(%arg0: i32) -> (i32, i32) {
    %c0_i32 = arith.constant 0 : i32
    %c0_i32_0 = arith.constant 0 : i32
    %c0_i32_1 = arith.constant 0 : i32
    return %c0_i32, %c0_i32_0 : i32, i32
  }
  func.func @transform_3(%arg0: i32) -> (i32, i32) {
    %c0_i32 = arith.constant 0 : i32
    %c0_i32_0 = arith.constant 0 : i32
    %c0_i32_1 = arith.constant 0 : i32
    return %c0_i32, %c0_i32_0 : i32, i32
  }
  func.func @transform_4(%arg0: i32) -> (i32, i32, i32) {
    %c0_i32 = arith.constant 0 : i32
    %c0_i32_0 = arith.constant 0 : i32
    %c0_i32_1 = arith.constant 0 : i32
    %c0_i32_2 = arith.constant 0 : i32
    return %c0_i32, %c0_i32_0, %c0_i32_1 : i32, i32, i32
  }
  func.func @transform_5(%arg0: i32) -> (i32, i32) {
    %c0_i32 = arith.constant 0 : i32
    %c0_i32_0 = arith.constant 0 : i32
    %c0_i32_1 = arith.constant 0 : i32
    return %c0_i32, %c0_i32_0 : i32, i32
  }
  func.func @transform_6(%arg0: i32) -> (i32, i32) {
    %c0_i32 = arith.constant 0 : i32
    %c0_i32_0 = arith.constant 0 : i32
    %c0_i32_1 = arith.constant 0 : i32
    return %c0_i32, %c0_i32_0 : i32, i32
  }
  func.func @transform_7(%arg0: i32) -> (i32, i32) {
    %c0_i32 = arith.constant 0 : i32
    %c0_i32_0 = arith.constant 0 : i32
    %c0_i32_1 = arith.constant 0 : i32
    return %c0_i32, %c0_i32_0 : i32, i32
  }
  func.func @transform_8(%arg0: i32) -> (i32, i32) {
    %c0_i32 = arith.constant 0 : i32
    %c0_i32_0 = arith.constant 0 : i32
    %c0_i32_1 = arith.constant 0 : i32
    return %c0_i32, %c0_i32_0 : i32, i32
  }
  func.func @transform_9(%arg0: i32) -> (i32, i32) {
    %c0_i32 = arith.constant 0 : i32
    %c0_i32_0 = arith.constant 0 : i32
    %c0_i32_1 = arith.constant 0 : i32
    return %c0_i32, %c0_i32_0 : i32, i32
  }
  func.func @transform_10(%arg0: i32) -> (i32, i32) {
    %c0_i32 = arith.constant 0 : i32
    %c0_i32_0 = arith.constant 0 : i32
    return %arg0, %c0_i32 : i32, i32
  }
  func.func @transform_11(%arg0: i32) -> (i32, i32) {
    %c0_i32 = arith.constant 0 : i32
    %c0_i32_0 = arith.constant 0 : i32
    return %arg0, %c0_i32 : i32, i32
  }
  func.func @transform_12(%arg0: i32) -> (i32, i32) {
    %c0_i32 = arith.constant 0 : i32
    %c0_i32_0 = arith.constant 0 : i32
    return %arg0, %c0_i32 : i32, i32
  }
}

</mosaic_0001>

<bundles_post_ra>
// kernel: ac_discriminator_forward.1
= control target key start
LH: loop header
LB: loop body
LE: loop exit
PB: predicated region body
PF: predicated region fallthrough
CT: control target
= control target key end

     0   :  { %v2476_v1 = vmov 0   ;;  %vm152_vm0 = vcmask 523264   ;;  %v2477_v21 = vmov 0.0   ;;  %s3177_s0 = inlined_call_operand.vmem [shape: bf16[8,192], index: 0, kind: input, shape index: {}]   ;;  %s3178_s1 = inlined_call_operand.vmem [shape: bf16[8,192], index: 1, kind: input, shape index: {}]   ;;  %s3179_s2 = inlined_call_operand.vmem [shape: bf16[192,128], index: 2, kind: input, shape index: {}]   ;;  %s3180_s3 = inlined_call_operand.vmem [shape: f32[1,128], index: 3, kind: input, shape index: {}]   ;;  %s3181_s4 = inlined_call_operand.vmem [shape: bf16[3,128,128], index: 4, kind: input, shape index: {}]   ;;  %s3182_s5 = inlined_call_operand.vmem [shape: f32[1,128], index: 5, kind: input, shape index: {}]   ;;  %s3183_s6 = inlined_call_operand.vmem [shape: bf16[128,1024], index: 6, kind: input, shape index: {}]   ;;  %s3184_s7 = inlined_call_operand.vmem [shape: f32[1,1024], index: 7, kind: input, shape index: {}]   ;;  %s3185_s8 = inlined_call_operand.vmem [shape: bf16[1024,11], index: 8, kind: input, shape index: {}]   ;;  %s3186_s9 = inlined_call_operand.vmem [shape: f32[1,11], index: 9, kind: input, shape index: {}]   ;;  %s3187_s10 = inlined_call_operand.vmem [shape: s32[2,1], index: 10, kind: input, shape index: {}]   ;;  %s3188_s11 = inlined_call_operand.vmem [shape: f32[2,1], index: 11, kind: output, shape index: {0}]   ;;  %s3189_s12 = inlined_call_operand.hbm [shape: f32[1,1], index: 12, kind: output, shape index: {1}]  }
   0x1   :  { %v2344_v0 = vld [vmem:[%s3179_s2] sm:$0xff]   ;;  %156 = vmatprep.subr.bf16.mxu0 %v2476_v1  ;;  %207 = vmatprep.subr.bf16.mxu1 %v2476_v1  ;;  %v2345_v2 = vld [vmem:[%s3179_s2 + $0x8] sm:$0xff]   ;;  %v2346_v3 = vld [vmem:[%s3179_s2 + $0x10] sm:$0xff]  }
   0x2   :  { %157 = vmatpush1.bf16.msra.mxu0 %v2344_v0  ;;  %208 = vmatpush1.bf16.msra.mxu1 %v2344_v0  ;;  %v2347_v4 = vld [vmem:[%s3179_s2 + $0x18] sm:$0xff]   ;;  %v67_v5 = vld [vmem:[%s3177_s0] sm:$0xff]  ;;  %v2349_v10 = vld [vmem:[%s3179_s2 + $0x28] sm:$0xff]  }
   0x3   :  { %158 = vmatprep.subr.bf16.mxu0 %v2476_v1  ;;  %209 = vmatprep.subr.bf16.mxu1 %v2476_v1  ;;  %v197_v6 = vld [vmem:[%s3178_s1] sm:$0xff]  ;;  %v1959_v7 = vcombine.high %v67_v5, %v67_v5  ;;  %v2350_v11 = vld [vmem:[%s3179_s2 + $0x30] sm:$0xff]   ;;  %v2351_v12 = vld [vmem:[%s3179_s2 + $0x38] sm:$0xff]   ;;  %v1958_v19 = vcombine.low %v67_v5, %v67_v5 }
   0x4   :  { %2342 = vset.pattern.permute.xlu1 %v2476_v1  ;;  %2343 = vset.pattern.permute.xlu0 %v2476_v1  ;;  %v1974_v8 = vcombine.high %v197_v6, %v197_v6  ;;  %v2348_v9 = vld [vmem:[%s3179_s2 + $0x20] sm:$0xff]   ;;  %v2353_v14 = vld [vmem:[%s3179_s2 + $0x48] sm:$0xff]   ;;  %v2354_v15 = vld [vmem:[%s3179_s2 + $0x50] sm:$0xff]   ;;  %v1973_v20 = vcombine.low %v197_v6, %v197_v6 }
   0x5   :  { %1972 = vmatprep.mubr.msk.bf16.mxu0 %vm152_vm0, %v1959_v7  ;;  %v2352_v13 = vld [vmem:[%s3179_s2 + $0x40] sm:$0xff]   ;;  %v2355_v16 = vld [vmem:[%s3179_s2 + $0x58] sm:$0xff]   ;;  %v2361_v22 = vld [vmem:[%s3181_s4 + $0x48] sm:$0xff]  }
   0x6   :  { %159 = vmatpush1.bf16.msra.mxu0 %v2345_v2  ;;  %210 = vmatpush1.bf16.msra.mxu1 %v2345_v2  ;;  %v2360_v17 = vld [vmem:[%s3181_s4 + $0x40] sm:$0xff]   ;;  %v2365_v23 = vld [vmem:[%s3181_s4 + $0x8] sm:$0xff]   ;;  %v2362_v24 = vld [vmem:[%s3181_s4 + $0x50] sm:$0xff]  }
   0x7   :  { %160 = vmatprep.subr.bf16.mxu0 %v2476_v1  ;;  %211 = vmatprep.subr.bf16.mxu1 %v2476_v1  ;;  %v2363_v18 = vld [vmem:[%s3181_s4] sm:$0xff]   ;;  %v2367_v25 = vld [vmem:[%s3181_s4 + $0x10] sm:$0xff]   ;;  %v2364_v26 = vld [vmem:[%s3181_s4 + $0x58] sm:$0xff]  }
   0x8   :  { %1975 = vmatprep.mubr.msk.bf16.mxu1 %vm152_vm0, %v1974_v8  ;;  %v2369_v27 = vld [vmem:[%s3181_s4 + $0x18] sm:$0xff]   ;;  %v2366_v28 = vld [vmem:[%s3181_s4 + $0x60] sm:$0xff]   ;;  %v2368_v30 = vld [vmem:[%s3181_s4 + $0x68] sm:$0xff]  }
   0x9   :  { %v2371_v29 = vld [vmem:[%s3181_s4 + $0x20] sm:$0xff]   ;;  %v2370_v31 = vld [vmem:[%s3181_s4 + $0x70] sm:$0xff]  }
   0xa   :  { %161 = vmatpush1.bf16.msra.mxu0 %v2346_v3  ;;  %212 = vmatpush1.bf16.msra.mxu1 %v2346_v3 }
   0xb   :  { %162 = vmatprep.subr.bf16.mxu0 %v2476_v1  ;;  %213 = vmatprep.subr.bf16.mxu1 %v2476_v1 }
   0xe   :  { %163 = vmatpush1.bf16.msra.mxu0 %v2347_v4  ;;  %214 = vmatpush1.bf16.msra.mxu1 %v2347_v4 }
   0xf   :  { %164 = vmatprep.subr.bf16.mxu0 %v2476_v1  ;;  %215 = vmatprep.subr.bf16.mxu1 %v2476_v1 }
  0x12   :  { %165 = vmatpush1.bf16.msra.mxu0 %v2348_v9  ;;  %216 = vmatpush1.bf16.msra.mxu1 %v2348_v9 }
  0x13   :  { %166 = vmatprep.subr.bf16.mxu0 %v2476_v1  ;;  %217 = vmatprep.subr.bf16.mxu1 %v2476_v1 }
  0x16   :  { %167 = vmatpush1.bf16.msra.mxu0 %v2349_v10  ;;  %218 = vmatpush1.bf16.msra.mxu1 %v2349_v10 }
  0x17   :  { %168 = vmatprep.subr.bf16.mxu0 %v2476_v1  ;;  %219 = vmatprep.subr.bf16.mxu1 %v2476_v1 }
  0x1a   :  { %169 = vmatpush1.bf16.msra.mxu0 %v2350_v11  ;;  %220 = vmatpush1.bf16.msra.mxu1 %v2350_v11 }
  0x1b   :  { %170 = vmatprep.subr.bf16.mxu0 %v2476_v1  ;;  %221 = vmatprep.subr.bf16.mxu1 %v2476_v1 }
  0x1e   :  { %171 = vmatpush1.bf16.msra.mxu0 %v2351_v12  ;;  %222 = vmatpush1.bf16.msra.mxu1 %v2351_v12 }
  0x1f   :  { %172 = vmatprep.subr.bf16.mxu0 %v2476_v1  ;;  %223 = vmatprep.subr.bf16.mxu1 %v2476_v1 }
  0x22   :  { %173 = vmatpush1.bf16.msra.mxu0 %v2352_v13  ;;  %224 = vmatpush1.bf16.msra.mxu1 %v2352_v13 }
  0x23   :  { %174 = vmatprep.subr.bf16.mxu0 %v2476_v1  ;;  %225 = vmatprep.subr.bf16.mxu1 %v2476_v1 }
  0x26   :  { %175 = vmatpush1.bf16.msra.mxu0 %v2353_v14  ;;  %226 = vmatpush1.bf16.msra.mxu1 %v2353_v14 }
  0x27   :  { %176 = vmatprep.subr.bf16.mxu0 %v2476_v1  ;;  %227 = vmatprep.subr.bf16.mxu1 %v2476_v1 }
  0x2a   :  { %177 = vmatpush1.bf16.msra.mxu0 %v2354_v15  ;;  %228 = vmatpush1.bf16.msra.mxu1 %v2354_v15 }
  0x2b   :  { %178 = vmatprep.subr.bf16.mxu0 %v2476_v1  ;;  %229 = vmatprep.subr.bf16.mxu1 %v2476_v1 }
  0x2e   :  { %179 = vmatpush1.bf16.msra.mxu0 %v2355_v16  ;;  %230 = vmatpush1.bf16.msra.mxu1 %v2355_v16 }
  0x2f   :  { %2277 = vmatprep.subr.bf16.mxu0 %v2477_v21  ;;  %2297 = vmatprep.subr.bf16.mxu1 %v2477_v21 }
  0x31   :  { %189 = vmatmul.mubr.bf16.vlgmr.msra.gmra.mrb[0].mxu0 %v1958_v19  ;;  %240 = vmatmul.mubr.bf16.vlgmr.msra.gmra.mrb[0].mxu1 %v1973_v20 }
  0x32   :  { %2278 = vmatpush3.bf16.msra.mxu0 %v2360_v17  ;;  %2298 = vmatpush3.bf16.msra.mxu1 %v2363_v18 }
  0x33   :  { %2279 = vmatprep.subr.bf16.mxu0 %v2477_v21  ;;  %2299 = vmatprep.subr.bf16.mxu1 %v2477_v21 }
  0x36   :  { %2280 = vmatpush3.bf16.msra.mxu0 %v2361_v22  ;;  %2300 = vmatpush3.bf16.msra.mxu1 %v2365_v23 }
  0x37   :  { %2281 = vmatprep.subr.bf16.mxu0 %v2477_v21  ;;  %2301 = vmatprep.subr.bf16.mxu1 %v2477_v21 }
  0x3a   :  { %2282 = vmatpush3.bf16.msra.mxu0 %v2362_v24  ;;  %2302 = vmatpush3.bf16.msra.mxu1 %v2367_v25 }
  0x3b   :  { %2283 = vmatprep.subr.bf16.mxu0 %v2477_v21  ;;  %2303 = vmatprep.subr.bf16.mxu1 %v2477_v21 }
  0x3e   :  { %2284 = vmatpush3.bf16.msra.mxu0 %v2364_v26  ;;  %2304 = vmatpush3.bf16.msra.mxu1 %v2369_v27 }
  0x3f   :  { %2285 = vmatprep.subr.bf16.mxu0 %v2477_v21  ;;  %2305 = vmatprep.subr.bf16.mxu1 %v2477_v21 }
  0x42   :  { %2286 = vmatpush3.bf16.msra.mxu0 %v2366_v28  ;;  %2306 = vmatpush3.bf16.msra.mxu1 %v2371_v29 }
  0x43   :  { %2287 = vmatprep.subr.bf16.mxu0 %v2477_v21  ;;  %2307 = vmatprep.subr.bf16.mxu1 %v2477_v21 }
  0x46   :  { %2288 = vmatpush3.bf16.msra.mxu0 %v2368_v30 }
  0x47   :  { %2289 = vmatprep.subr.bf16.mxu0 %v2477_v21 }
  0x4a   :  { %2290 = vmatpush3.bf16.msra.mxu0 %v2370_v31 }
  0x4b   :  { %2291 = vmatprep.subr.bf16.mxu0 %v2477_v21 }
  0x4c   :  { %18 = vsyncpa [#allocation3], 0  ;;  %v2372_v32 = vld [vmem:[%s3181_s4 + $0x78] sm:$0xff]   ;;  %v2373_v33 = vld [vmem:[%s3181_s4 + $0x28] sm:$0xff]   ;;  %vm2478_vm1 = vmmov 0   ;;  %vm254_vm2 = vcmask 1040384  }
  0x4d   :  { %2308 = vmatpush3.bf16.msra.mxu1 %v2373_v33  ;;  %v2374_v34 = vld [vmem:[%s3181_s4 + $0x30] sm:$0xff]   ;;  %2293 = vmatprep.mubr.msk.bf16.mxu0 %vm2478_vm1, %v2477_v21  ;;  %v2376_v35 = vld [vmem:[%s3181_s4 + $0x38] sm:$0xff]   ;;  %v1957_v36 = vld [vmem:[%s3180_s3] ss:$0 sm:$0xff]  ;;  %vm591_vm3 = vcmask 1043456   ;;  %vm718_vm4 = vcmask 1041409  }
  0x4e   :  { %2292 = vmatpush3.bf16.msra.mxu0 %v2372_v32  ;;  %2309 = vmatprep.subr.bf16.mxu1 %v2477_v21  ;;  %v2375_v49 = vld [vmem:[%s3181_s4 + $0x80] sm:$0xff]   ;;  %v2377_v55 = vld [vmem:[%s3181_s4 + $0x88] sm:$0xff]   ;;  %v2378_v59 = vld [vmem:[%s3181_s4 + $0x90] sm:$0xff]   ;;  %vm1893_vm5 = vcmask 1024   ;;  %vm1895_vm6 = vcmask 82952   ;;  %s2479_s29 = smov 127  }
  0x4f   :  { %2317 = vmatprep.subr.bf16.mxu0 %v2477_v21  ;;  %2313 = vmatprep.mubr.msk.bf16.mxu1 %vm2478_vm1, %v2477_v21  ;;  %v2379_v60 = vld [vmem:[%s3181_s4 + $0x98] sm:$0xff]   ;;  %v2380_v61 = vld [vmem:[%s3181_s4 + $0xa0] sm:$0xff]   ;;  %v2381_v62 = vld [vmem:[%s3181_s4 + $0xa8] sm:$0xff]   ;;  %vm1906_vm8 = vcmask 74752   ;;  %vm1929_vm9 = vcmask 1041408   ;;  %vm1937_vm10 = vcmask 0  }
  0x50   :  { %v2382_v63 = vld [vmem:[%s3181_s4 + $0xb0] sm:$0xff]   ;;  %v2383_v0 = vld [vmem:[%s3181_s4 + $0xb8] sm:$0xff]   ;;  %v608_v3 = vld [vmem:[%s3183_s6] sm:$0xff] }
  0x51   :  { %2310 = vmatpush3.bf16.msra.mxu1 %v2374_v34  ;;  %v612_v4 = vld [vmem:[%s3183_s6 + $0x20] sm:$0xff]  ;;  %v609_v5 = vld [vmem:[%s3183_s6 + $0x8] sm:$0xff] }
  0x52   :  { %2311 = vmatprep.subr.bf16.mxu1 %v2477_v21  ;;  %v2033_v6 = vcombine.low %v608_v3, %v612_v4  ;;  %v2034_v7 = vcombine.high %v608_v3, %v612_v4  ;;  %v613_v8 = vld [vmem:[%s3183_s6 + $0x28] sm:$0xff]  ;;  %v616_v11 = vld [vmem:[%s3183_s6 + $0x40] sm:$0xff]  ;;  %v2825_v3 = vld [vmem:[%s3183_s6 + $0x30] sm:$0xff] }
  0x53   :  { %v2035_v9 = vcombine.low %v609_v5, %v613_v8  ;;  %v2036_v10 = vcombine.high %v609_v5, %v613_v8  ;;  %v620_v12 = vld [vmem:[%s3183_s6 + $0x60] sm:$0xff]  ;;  %v617_v13 = vld [vmem:[%s3183_s6 + $0x48] sm:$0xff]  ;;  %v2834_v8 = vld [vmem:[%s3183_s6 + $0x18] sm:$0xff] }
  0x54   :  { %v2042_v14 = vcombine.high %v616_v11, %v620_v12  ;;  %v621_v15 = vld [vmem:[%s3183_s6 + $0x68] sm:$0xff]  ;;  %v2041_v16 = vcombine.low %v616_v11, %v620_v12  ;;  %v624_v19 = vld [vmem:[%s3183_s6 + $0x80] sm:$0xff] }
  0x55   :  { %2312 = vmatpush3.bf16.msra.mxu1 %v2376_v35  ;;  %v2043_v17 = vcombine.low %v617_v13, %v621_v15  ;;  %v2044_v18 = vcombine.high %v617_v13, %v621_v15  ;;  %v628_v20 = vld [vmem:[%s3183_s6 + $0xa0] sm:$0xff]  ;;  %v625_v22 = vld [vmem:[%s3183_s6 + $0x88] sm:$0xff] }
  0x56   :  { %1042 = vmatprep.subr.bf16.mxu1 %v2034_v7  ;;  %v629_v23 = vld [vmem:[%s3183_s6 + $0xa8] sm:$0xff]  ;;  %v2049_v24 = vcombine.low %v624_v19, %v628_v20  ;;  %v632_v27 = vld [vmem:[%s3183_s6 + $0xc0] sm:$0xff] }
  0x57   :  { %v2051_v25 = vcombine.low %v625_v22, %v629_v23  ;;  %v2052_v26 = vcombine.high %v625_v22, %v629_v23  ;;  %v636_v28 = vld [vmem:[%s3183_s6 + $0xe0] sm:$0xff]  ;;  %v633_v29 = vld [vmem:[%s3183_s6 + $0xc8] sm:$0xff] }
  0x58   :  { %v2058_v30 = vcombine.high %v632_v27, %v636_v28  ;;  %v637_v31 = vld [vmem:[%s3183_s6 + $0xe8] sm:$0xff]  ;;  %v2057_v32 = vcombine.low %v632_v27, %v636_v28  ;;  %v640_v35 = vld [vmem:[%s3183_s6 + $0x100] sm:$0xff] }
  0x59   :  { %v2059_v33 = vcombine.low %v633_v29, %v637_v31  ;;  %v2060_v34 = vcombine.high %v633_v29, %v637_v31  ;;  %v2032_v22 = vld [vmem:[%s3182_s5] ss:$0 sm:$0xff] }
 0x104   :  { %v190_v37 = vpop.f32.mrb[0].mxu0  ;;  %v241_v38 = vpop.f32.mrb[0].mxu1 }
 0x105   :  { %v191_v39 = vadd.f32 %v1957_v36, %v190_v37  ;;  %v242_v40 = vadd.f32 %v1957_v36, %v241_v38  ;;  %v192_v41 = vpop.f32.mrb[1].mxu0  ;;  %v243_v42 = vpop.f32.mrb[1].mxu1  ;;  %v644_v36 = vld [vmem:[%s3183_s6 + $0x120] sm:$0xff]  ;;  %v641_v37 = vld [vmem:[%s3183_s6 + $0x108] sm:$0xff] }
 0x106   :  { %v193_v43 = vpop.f32.mrb[2].mxu0  ;;  %v244_v44 = vpop.f32.mrb[2].mxu1  ;;  %v2066_v38 = vcombine.high %v640_v35, %v644_v36 }
 0x107   :  { %v196_v45 = vmax.f32 %v191_v39, 0.0  ;;  %v247_v46 = vmax.f32 %v242_v40, 0.0  ;;  %v194_v47 = vpop.f32.mrb[3].mxu0  ;;  %v245_v48 = vpop.f32.mrb[3].mxu1  ;;  %v645_v39 = vld [vmem:[%s3183_s6 + $0x128] sm:$0xff]  ;;  %v2065_v40 = vcombine.low %v640_v35, %v644_v36  ;;  %v648_v43 = vld [vmem:[%s3183_s6 + $0x140] sm:$0xff] }
 0x108   :  { %v2067_v41 = vcombine.low %v641_v37, %v645_v39  ;;  %v2068_v42 = vcombine.high %v641_v37, %v645_v39  ;;  %v652_v44 = vld [vmem:[%s3183_s6 + $0x160] sm:$0xff]  ;;  %v653_v47 = vld [vmem:[%s3183_s6 + $0x168] sm:$0xff] }
 0x109   :  { %v278_v50 = vpack.c.bf16 %v196_v45, %v196_v45  ;;  %v249_v51 = vcombine.high %v247_v46, %v247_v46  ;;  %v250_v52 = vrot.slane %v247_v46, 7  ;;  %v472_v2 = vpack.c.bf16 %v247_v46, %v247_v46  ;;  %v649_v45 = vld [vmem:[%s3183_s6 + $0x148] sm:$0xff] }
 0x10a   :  { %v2074_v46 = vcombine.high %v648_v43, %v652_v44  ;;  %v2073_v48 = vcombine.low %v648_v43, %v652_v44 }
 0x10b   :  { %v251_v53 = vrot.slane %v249_v51, 7  ;;  %v255_v54 = vsel %vm254_vm2, 0.0, %v250_v52  ;;  %2294 = vmatmul.mubr.bf16.vlgmr.msra.gmra.mrb[4].mxu0 %v278_v50  ;;  %v2076_v50 = vcombine.high %v649_v45, %v653_v47  ;;  %v656_v51 = vld [vmem:[%s3183_s6 + $0x180] sm:$0xff] }
 0x10c   :  { %2318 = vmatpush3.bf16.msra.mxu0 %v2375_v49  ;;  %2333 = vmatprep.mubr.msk.bf16.mxu0 %vm2478_vm1, %v2477_v21  ;;  %v2075_v49 = vcombine.low %v649_v45, %v653_v47  ;;  %v660_v52 = vld [vmem:[%s3183_s6 + $0x1a0] sm:$0xff] }
 0x10d   :  { %v256_v56 = vsel %vm254_vm2, 0.0, %v251_v53  ;;  %2319 = vmatprep.subr.bf16.mxu0 %v2477_v21  ;;  %v657_v53 = vld [vmem:[%s3183_s6 + $0x188] sm:$0xff] }
 0x10e   :  { %v259_v57 = vcombine.low %v255_v54, %v256_v56  ;;  %v2082_v54 = vcombine.high %v656_v51, %v660_v52  ;;  %v2081_v56 = vcombine.low %v656_v51, %v660_v52  ;;  %v623_v51 = vld [vmem:[%s3183_s6 + $0x78] sm:$0xff] }
 0x110   :  { %2320 = vmatpush3.bf16.msra.mxu0 %v2377_v55  ;;  %v261_v58 = vpack.c.bf16 %v259_v57, %v259_v57  ;;  %v661_v55 = vld [vmem:[%s3183_s6 + $0x1a8] sm:$0xff] }
 0x111   :  { %2321 = vmatprep.subr.bf16.mxu0 %v2477_v21  ;;  %v2083_v57 = vcombine.low %v657_v53, %v661_v55 }
 0x112   :  { %2314 = vmatmul.mubr.bf16.vlgmr.msra.gmra.mrb[4].mxu1 %v261_v58  ;;  %v2084_v58 = vcombine.high %v657_v53, %v661_v55 }
 0x113   :  { %1074 = vmatprep.mubr.bf16.mxu1 %v2476_v1  ;;  %1043 = vmatpush1.bf16.msra.mxu1 %v2033_v6 }
 0x114   :  { %2322 = vmatpush3.bf16.msra.mxu0 %v2378_v59  ;;  %1044 = vmatprep.subr.bf16.mxu1 %v2042_v14  ;;  %v664_v59 = vld [vmem:[%s3183_s6 + $0x1c0] sm:$0xff] }
 0x115   :  { %2323 = vmatprep.subr.bf16.mxu0 %v2477_v21 }
 0x117   :  { %1045 = vmatpush1.bf16.msra.mxu1 %v2041_v16 }
 0x118   :  { %2324 = vmatpush3.bf16.msra.mxu0 %v2379_v60  ;;  %v668_v60 = vld [vmem:[%s3183_s6 + $0x1e0] sm:$0xff] }
 0x119   :  { %2325 = vmatprep.subr.bf16.mxu0 %v2477_v21 }
 0x11c   :  { %2326 = vmatpush3.bf16.msra.mxu0 %v2380_v61  ;;  %v665_v61 = vld [vmem:[%s3183_s6 + $0x1c8] sm:$0xff] }
 0x11d   :  { %2327 = vmatprep.subr.bf16.mxu0 %v2477_v21 }
 0x120   :  { %2328 = vmatpush3.bf16.msra.mxu0 %v2381_v62  ;;  %v2089_v62 = vcombine.low %v664_v59, %v668_v60 }
 0x121   :  { %2329 = vmatprep.subr.bf16.mxu0 %v2477_v21 }
 0x124   :  { %2330 = vmatpush3.bf16.msra.mxu0 %v2382_v63  ;;  %v2090_v63 = vcombine.high %v664_v59, %v668_v60  ;;  %v631_v59 = vld [vmem:[%s3183_s6 + $0xb8] sm:$0xff] }
 0x125   :  { %2331 = vmatprep.subr.bf16.mxu0 %v2477_v21  ;;  %v2050_v21 = vcombine.high %v624_v19, %v628_v20 }
 0x127   :  { %1046 = vmatprep.subr.bf16.mxu1 %v2050_v21 }
 0x128   :  { %2332 = vmatpush3.bf16.msra.mxu0 %v2383_v0  ;;  %1047 = vmatpush1.bf16.msra.mxu1 %v2049_v24  ;;  %v669_v0 = vld [vmem:[%s3183_s6 + $0x1e8] sm:$0xff] }
 0x129   :  { %1083 = vmatprep.subr.bf16.mxu0 %v2036_v10  ;;  %1048 = vmatprep.subr.bf16.mxu1 %v2058_v30  ;;  %v2091_v4 = vcombine.low %v665_v61, %v669_v0  ;;  %v2092_v5 = vcombine.high %v665_v61, %v669_v0  ;;  %v634_v0 = vld [vmem:[%s3183_s6 + $0xd0] sm:$0xff] }
 0x12b   :  { %2334 = vmatmul.mubr.bf16.vlgmr.msra.gmra.mrb[8].mxu0 %v472_v2  ;;  %v2820_v2 = vld [vmem:[%s3183_s6 + $0x10] sm:$0xff] }
 0x12c   :  { %1115 = vmatprep.mubr.bf16.mxu0 %v2476_v1  ;;  %1084 = vmatpush1.bf16.msra.mxu0 %v2035_v9  ;;  %v2037_v6 = vcombine.low %v2820_v2, %v2825_v3  ;;  %v2038_v7 = vcombine.high %v2820_v2, %v2825_v3  ;;  %v615_v9 = vld [vmem:[%s3183_s6 + $0x38] sm:$0xff] }
 0x12d   :  { %1085 = vmatprep.subr.bf16.mxu0 %v2044_v18  ;;  %1049 = vmatpush1.bf16.msra.mxu1 %v2057_v32  ;;  %v2039_v10 = vcombine.low %v2834_v8, %v615_v9  ;;  %v2040_v11 = vcombine.high %v2834_v8, %v615_v9  ;;  %v635_v2 = vld [vmem:[%s3183_s6 + $0xd8] sm:$0xff]  ;;  %v642_v9 = vld [vmem:[%s3183_s6 + $0x110] sm:$0xff] }
 0x12e   :  { %1050 = vmatprep.subr.bf16.mxu1 %v2066_v38  ;;  %v639_v3 = vld [vmem:[%s3183_s6 + $0xf8] sm:$0xff] }
 0x12f   :  { %v2064_v8 = vcombine.high %v635_v2, %v639_v3 }
 0x130   :  { %1086 = vmatpush1.bf16.msra.mxu0 %v2043_v17 }
 0x131   :  { %1087 = vmatprep.subr.bf16.mxu0 %v2052_v26  ;;  %1051 = vmatpush1.bf16.msra.mxu1 %v2065_v40 }
 0x132   :  { %1052 = vmatprep.subr.bf16.mxu1 %v2074_v46  ;;  %v618_v46 = vld [vmem:[%s3183_s6 + $0x50] sm:$0xff] }
 0x134   :  { %1088 = vmatpush1.bf16.msra.mxu0 %v2051_v25 }
 0x135   :  { %1089 = vmatprep.subr.bf16.mxu0 %v2060_v34  ;;  %1053 = vmatpush1.bf16.msra.mxu1 %v2073_v48 }
 0x136   :  { %1054 = vmatprep.subr.bf16.mxu1 %v2082_v54 }
 0x138   :  { %1090 = vmatpush1.bf16.msra.mxu0 %v2059_v33 }
 0x139   :  { %1091 = vmatprep.subr.bf16.mxu0 %v2068_v42  ;;  %1055 = vmatpush1.bf16.msra.mxu1 %v2081_v56  ;;  %v626_v56 = vld [vmem:[%s3183_s6 + $0x90] sm:$0xff] }
 0x13a   :  { %1056 = vmatprep.subr.bf16.mxu1 %v2090_v63 }
 0x13c   :  { %1092 = vmatpush1.bf16.msra.mxu0 %v2067_v41 }
 0x13d   :  { %1093 = vmatprep.subr.bf16.mxu0 %v2076_v50  ;;  %1057 = vmatpush1.bf16.msra.mxu1 %v2089_v62  ;;  %v619_v50 = vld [vmem:[%s3183_s6 + $0x58] sm:$0xff] }
 0x13e   :  { %1124 = vmatprep.subr.bf16.mxu1 %v2038_v7  ;;  %v2048_v55 = vcombine.high %v619_v50, %v623_v51  ;;  %v2047_v61 = vcombine.low %v619_v50, %v623_v51  ;;  %v2392_v50 = vld [vmem:[%s3185_s8 + $0x50] sm:$0xff]  }
 0x13f   :  { %v2393_v51 = vld [vmem:[%s3185_s8 + $0xd0] sm:$0xff]  }
 0x140   :  { %1094 = vmatpush1.bf16.msra.mxu0 %v2075_v49  ;;  %v622_v49 = vld [vmem:[%s3183_s6 + $0x70] sm:$0xff] }
 0x141   :  { %1095 = vmatprep.subr.bf16.mxu0 %v2084_v58  ;;  %v2046_v54 = vcombine.high %v618_v46, %v622_v49  ;;  %v627_v58 = vld [vmem:[%s3183_s6 + $0x98] sm:$0xff]  ;;  %v2045_v60 = vcombine.low %v618_v46, %v622_v49  ;;  %v2388_v46 = vld [vmem:[%s3185_s8 + $0x48] sm:$0xff]  }
 0x142   :  { %v2056_v63 = vcombine.high %v627_v58, %v631_v59  ;;  %v2391_v49 = vld [vmem:[%s3185_s8 + $0x88] sm:$0xff]  }
 0x144   :  { %1096 = vmatpush1.bf16.msra.mxu0 %v2083_v57  ;;  %v630_v57 = vld [vmem:[%s3183_s6 + $0xb0] sm:$0xff] }
 0x145   :  { %1097 = vmatprep.subr.bf16.mxu0 %v2092_v5  ;;  %v2054_v62 = vcombine.high %v626_v56, %v630_v57  ;;  %v2053_v5 = vcombine.low %v626_v56, %v630_v57  ;;  %v2398_v56 = vld [vmem:[%s3185_s8 + $0x18] sm:$0xff]  }
 0x146   :  { %v2399_v57 = vld [vmem:[%s3185_s8 + $0x98] sm:$0xff]  }
 0x148   :  { %1098 = vmatpush1.bf16.msra.mxu0 %v2091_v4  ;;  %v638_v4 = vld [vmem:[%s3183_s6 + $0xf0] sm:$0xff] }
 0x149   :  { %1165 = vmatprep.subr.bf16.mxu0 %v2040_v11  ;;  %v2062_v7 = vcombine.high %v634_v0, %v638_v4  ;;  %v647_v11 = vld [vmem:[%s3183_s6 + $0x138] sm:$0xff] }
 0x1de   :  { %v378_v12 = vpop.f32.mrb[4].mxu0 }
 0x1df   :  { %v2295_v13 = vpop.f32.mrb[5].mxu0 }
 0x1e0   :  { %v381_v14 = vpop.f32.mrb[6].mxu0  ;;  %v2063_v13 = vcombine.low %v635_v2, %v639_v3  ;;  %v2408_v2 = vld [vmem:[%s3185_s8 + $0x70] sm:$0xff]  }
 0x1e1   :  { %v2296_v15 = vpop.f32.mrb[7].mxu0  ;;  %v2409_v3 = vld [vmem:[%s3185_s8 + $0xf0] sm:$0xff]  }
 0x1e5   :  { %v466_v16 = vpop.f32.mrb[4].mxu1 }
 0x1e6   :  { %v467_v17 = vadd.f32 %v466_v16, %v378_v12  ;;  %v2315_v18 = vpop.f32.mrb[5].mxu1  ;;  %v2061_v12 = vcombine.low %v634_v0, %v638_v4  ;;  %v650_v16 = vld [vmem:[%s3183_s6 + $0x150] sm:$0xff]  ;;  %v2406_v0 = vld [vmem:[%s3185_s8 + $0x28] sm:$0xff]  }
 0x1e7   :  { %v469_v19 = vpop.f32.mrb[6].mxu1  ;;  %v651_v18 = vld [vmem:[%s3183_s6 + $0x158] sm:$0xff]  ;;  %v2407_v4 = vld [vmem:[%s3185_s8 + $0xa8] sm:$0xff]  }
 0x1e8   :  { %v2316_v20 = vpop.f32.mrb[7].mxu1  ;;  %v655_v19 = vld [vmem:[%s3183_s6 + $0x178] sm:$0xff] }
 0x1fe   :  { %v572_v21 = vpop.f32.mrb[8].mxu0 }
 0x1ff   :  { %v578_v23 = vadd.f32 %v572_v21, %v467_v17  ;;  %v2335_v24 = vpop.f32.mrb[9].mxu0  ;;  %v654_v17 = vld [vmem:[%s3183_s6 + $0x170] sm:$0xff] }
 0x200   :  { %v575_v25 = vpop.f32.mrb[10].mxu0  ;;  %v658_v24 = vld [vmem:[%s3183_s6 + $0x190] sm:$0xff] }
 0x201   :  { %v586_v26 = vadd.f32 %v2032_v22, %v578_v23  ;;  %v2336_v27 = vpop.f32.mrb[11].mxu0  ;;  %v2078_v22 = vcombine.high %v650_v16, %v654_v17  ;;  %v2080_v23 = vcombine.high %v651_v18, %v655_v19  ;;  %v662_v25 = vld [vmem:[%s3183_s6 + $0x1b0] sm:$0xff] }
 0x202   :  { %v663_v27 = vld [vmem:[%s3183_s6 + $0x1b8] sm:$0xff] }
 0x203   :  { %v587_v28 = vmax.f32 %v586_v26, 0.0  ;;  %v659_v26 = vld [vmem:[%s3183_s6 + $0x198] sm:$0xff] }
 0x205   :  { %v589_v29 = vcombine.high %v587_v28, %v587_v28  ;;  %v592_v30 = vsel %vm591_vm3, %v587_v28, 0.0  ;;  %v2077_v28 = vcombine.low %v650_v16, %v654_v17  ;;  %v3049_v16 = vld [vmem:[%s3184_s7] sm:$0xff] }
 0x206   :  { %v593_v31 = vrot.slane %v592_v30, 4 }
 0x207   :  { %v599_v32 = vsel %vm591_vm3, %v589_v29, 0.0  ;;  %v2079_v29 = vcombine.low %v651_v18, %v655_v19 }
 0x208   :  { %v594_v33 = vadd.f32 %v593_v31, %v592_v30  ;;  %v600_v34 = vrot.slane %v599_v32, 4  ;;  %v2086_v30 = vcombine.high %v658_v24, %v662_v25  ;;  %v2088_v31 = vcombine.high %v659_v26, %v663_v27 }
 0x20a   :  { %v595_v35 = vrot.slane %v594_v33, 2  ;;  %v601_v36 = vadd.f32 %v600_v34, %v599_v32  ;;  %v666_v32 = vld [vmem:[%s3183_s6 + $0x1d0] sm:$0xff]  ;;  %v667_v34 = vld [vmem:[%s3183_s6 + $0x1d8] sm:$0xff] }
 0x20c   :  { %v596_v37 = vadd.f32 %v595_v35, %v594_v33  ;;  %v602_v38 = vrot.slane %v601_v36, 2  ;;  %v670_v33 = vld [vmem:[%s3183_s6 + $0x1f0] sm:$0xff]  ;;  %v671_v35 = vld [vmem:[%s3183_s6 + $0x1f8] sm:$0xff] }
 0x20e   :  { %v597_v39 = vrot.slane %v596_v37, 1  ;;  %v603_v40 = vadd.f32 %v602_v38, %v601_v36  ;;  %v2085_v36 = vcombine.low %v658_v24, %v662_v25  ;;  %v2094_v38 = vcombine.high %v666_v32, %v670_v33 }
 0x210   :  { %v598_v41 = vadd.f32 %v597_v39, %v596_v37  ;;  %v604_v42 = vrot.slane %v603_v40, 1  ;;  %v2087_v37 = vcombine.low %v659_v26, %v663_v27  ;;  %v2096_v39 = vcombine.high %v667_v34, %v671_v35 }
 0x212   :  { %v605_v43 = vadd.f32 %v604_v42, %v603_v40  ;;  %v606_v44 = vpack.c.bf16 %v598_v41, %v598_v41  ;;  %v2093_v40 = vcombine.low %v666_v32, %v670_v33  ;;  %v2095_v41 = vcombine.low %v667_v34, %v671_v35  ;;  %v2384_v42 = vld [vmem:[%s3185_s8 + $0x40] sm:$0xff]  }
 0x214   :  { %v607_v45 = vpack.c.bf16 %v605_v43, %v605_v43  ;;  %v716_v47 = vunpack.c.l.b16 %v606_v44  ;;  %v2385_v43 = vld [vmem:[%s3185_s8 + $0xc0] sm:$0xff]  }
 0x215   :  { %v2386_v44 = vld [vmem:[%s3185_s8] sm:$0xff]  }
 0x216   :  { %v717_v48 = vunpack.c.l.b16 %v607_v45  ;;  %v2387_v45 = vld [vmem:[%s3185_s8 + $0x80] sm:$0xff]  }
 0x218   :  { %v719_v52 = vsel %vm718_vm4, %v717_v48, %v716_v47  ;;  %v2389_v47 = vld [vmem:[%s3185_s8 + $0xc8] sm:$0xff]  }
 0x219   :  { %v2856_v53 = vpack.c.b16 %v719_v52, %v719_v52  ;;  %v2390_v48 = vld [vmem:[%s3185_s8 + $0x8] sm:$0xff]   ;;  %v2394_v52 = vld [vmem:[%s3185_s8 + $0x10] sm:$0xff]  }
 0x21b   :  { %1075 = vmatmul.mubr.bf16.vlgmr.msra.gmra.mrb[8].mxu1 %v2856_v53  ;;  %1116 = vmatmul.mubr.bf16.vlgmr.msra.gmra.mrb[12].mxu0 %v2856_v53 }
 0x21c   :  { %1125 = vmatpush1.bf16.msra.mxu1 %v2037_v6  ;;  %1166 = vmatpush1.bf16.msra.mxu0 %v2039_v10  ;;  %v2055_v6 = vcombine.low %v627_v58, %v631_v59  ;;  %v646_v10 = vld [vmem:[%s3183_s6 + $0x130] sm:$0xff]  ;;  %v2400_v58 = vld [vmem:[%s3185_s8 + $0x60] sm:$0xff]  }
 0x21d   :  { %1126 = vmatprep.subr.bf16.mxu1 %v2046_v54  ;;  %1167 = vmatprep.subr.bf16.mxu0 %v2048_v55  ;;  %v2070_v14 = vcombine.high %v642_v9, %v646_v10  ;;  %v2069_v20 = vcombine.low %v642_v9, %v646_v10  ;;  %v2396_v54 = vld [vmem:[%s3185_s8 + $0x58] sm:$0xff]   ;;  %v2401_v59 = vld [vmem:[%s3185_s8 + $0xe0] sm:$0xff]  }
 0x21e   :  { %1156 = vmatprep.mubr.bf16.mxu1 %v2476_v1  ;;  %1197 = vmatprep.mubr.bf16.mxu0 %v2476_v1  ;;  %v643_v1 = vld [vmem:[%s3183_s6 + $0x118] sm:$0xff] }
 0x21f   :  { %v2072_v15 = vcombine.high %v643_v1, %v647_v11  ;;  %v2071_v21 = vcombine.low %v643_v1, %v647_v11  ;;  %v2397_v55 = vld [vmem:[%s3185_s8 + $0xd8] sm:$0xff]   ;;  %v2416_v1 = vld [vmem:[%s3185_s8 + $0x140] sm:$0xff]  }
 0x220   :  { %1127 = vmatpush1.bf16.msra.mxu1 %v2045_v60  ;;  %1168 = vmatpush1.bf16.msra.mxu0 %v2047_v61  ;;  %v2402_v60 = vld [vmem:[%s3185_s8 + $0x20] sm:$0xff]   ;;  %v2414_v9 = vld [vmem:[%s3185_s8 + $0x38] sm:$0xff]  }
 0x221   :  { %1128 = vmatprep.subr.bf16.mxu1 %v2054_v62  ;;  %1169 = vmatprep.subr.bf16.mxu0 %v2056_v63  ;;  %v2403_v61 = vld [vmem:[%s3185_s8 + $0xa0] sm:$0xff]   ;;  %v2404_v62 = vld [vmem:[%s3185_s8 + $0x68] sm:$0xff]   ;;  %v2415_v10 = vld [vmem:[%s3185_s8 + $0xb8] sm:$0xff]  }
 0x222   :  { %v2405_v63 = vld [vmem:[%s3185_s8 + $0xe8] sm:$0xff]   ;;  %v2417_v11 = vld [vmem:[%s3185_s8 + $0x1c0] sm:$0xff]  }
 0x224   :  { %1129 = vmatpush1.bf16.msra.mxu1 %v2053_v5  ;;  %1170 = vmatpush1.bf16.msra.mxu0 %v2055_v6  ;;  %v2410_v5 = vld [vmem:[%s3185_s8 + $0x30] sm:$0xff]  }
 0x225   :  { %1130 = vmatprep.subr.bf16.mxu1 %v2062_v7  ;;  %1171 = vmatprep.subr.bf16.mxu0 %v2064_v8  ;;  %v2411_v6 = vld [vmem:[%s3185_s8 + $0xb0] sm:$0xff]   ;;  %v2412_v7 = vld [vmem:[%s3185_s8 + $0x78] sm:$0xff]  }
 0x226   :  { %v2413_v8 = vld [vmem:[%s3185_s8 + $0xf8] sm:$0xff]  }
 0x228   :  { %1131 = vmatpush1.bf16.msra.mxu1 %v2061_v12  ;;  %1172 = vmatpush1.bf16.msra.mxu0 %v2063_v13  ;;  %v674_v12 = vlaneseq }
 0x229   :  { %1132 = vmatprep.subr.bf16.mxu1 %v2070_v14  ;;  %1173 = vmatprep.subr.bf16.mxu0 %v2072_v15 }
 0x22a   :  { %v3042_v13 = vshrl.u32 %v674_v12, 7 }
 0x22c   :  { %1133 = vmatpush1.bf16.msra.mxu1 %v2069_v20  ;;  %1174 = vmatpush1.bf16.msra.mxu0 %v2071_v21  ;;  %v676_v14 = vsub.s32 0, %v3042_v13  ;;  %v684_v15 = vsub.s32 2, %v3042_v13  ;;  %v680_v17 = vsub.s32 1, %v3042_v13  ;;  %v688_v18 = vsub.s32 3, %v3042_v13 }
 0x22d   :  { %1134 = vmatprep.subr.bf16.mxu1 %v2078_v22  ;;  %1175 = vmatprep.subr.bf16.mxu0 %v2080_v23 }
 0x22e   :  { %v677_v19 = vrot.slane %v3049_v16, %v676_v14  ;;  %v685_v20 = vrot.slane %v3049_v16, %v684_v15  ;;  %v681_v21 = vrot.slane %v3049_v16, %v680_v17  ;;  %v689_v22 = vrot.slane %v3049_v16, %v688_v18  ;;  %v2446_v14 = vld [vmem:[%s3185_s8 + $0x138] sm:$0xff]  }
 0x22f   :  { %v2447_v15 = vld [vmem:[%s3185_s8 + $0x1b8] sm:$0xff]  }
 0x230   :  { %1135 = vmatpush1.bf16.msra.mxu1 %v2077_v28  ;;  %1176 = vmatpush1.bf16.msra.mxu0 %v2079_v29 }
 0x231   :  { %1136 = vmatprep.subr.bf16.mxu1 %v2086_v30  ;;  %1177 = vmatprep.subr.bf16.mxu0 %v2088_v31 }
 0x234   :  { %1137 = vmatpush1.bf16.msra.mxu1 %v2085_v36  ;;  %1178 = vmatpush1.bf16.msra.mxu0 %v2087_v37  ;;  %v2418_v37 = vld [vmem:[%s3185_s8 + $0x100] sm:$0xff]  }
 0x235   :  { %1138 = vmatprep.subr.bf16.mxu1 %v2094_v38  ;;  %1179 = vmatprep.subr.bf16.mxu0 %v2096_v39  ;;  %v2419_v38 = vld [vmem:[%s3185_s8 + $0x180] sm:$0xff]  }
 0x238   :  { %1139 = vmatpush1.bf16.msra.mxu1 %v2093_v40  ;;  %1180 = vmatpush1.bf16.msra.mxu0 %v2095_v41  ;;  %v2420_v41 = vld [vmem:[%s3185_s8 + $0x148] sm:$0xff]  }
 0x239   :  { %2189 = vmatprep.subr.bf16.mxu1 %v2384_v42  ;;  %2211 = vmatprep.subr.bf16.mxu0 %v2385_v43  ;;  %v2421_v42 = vld [vmem:[%s3185_s8 + $0x1c8] sm:$0xff]  }
 0x23a   :  { %v2422_v43 = vld [vmem:[%s3185_s8 + $0x108] sm:$0xff]  }
 0x23b   :  { %1157 = vmatmul.mubr.bf16.vlgmr.msra.gmra.mrb[12].mxu1 %v2856_v53  ;;  %1198 = vmatmul.mubr.bf16.vlgmr.msra.gmra.mrb[16].mxu0 %v2856_v53  ;;  %v2395_v53 = vld [vmem:[%s3185_s8 + $0x90] sm:$0xff]  }
 0x23c   :  { %2190 = vmatpush3.bf16.msra.mxu1 %v2386_v44  ;;  %2212 = vmatpush3.bf16.msra.mxu0 %v2387_v45  ;;  %v2423_v44 = vld [vmem:[%s3185_s8 + $0x188] sm:$0xff]   ;;  %v2424_v45 = vld [vmem:[%s3185_s8 + $0x150] sm:$0xff]  }
 0x23d   :  { %2191 = vmatprep.subr.bf16.mxu1 %v2388_v46  ;;  %2213 = vmatprep.subr.bf16.mxu0 %v2389_v47  ;;  %v2425_v46 = vld [vmem:[%s3185_s8 + $0x1d0] sm:$0xff]  }
 0x23e   :  { %v2426_v47 = vld [vmem:[%s3185_s8 + $0x110] sm:$0xff]  }
 0x240   :  { %2192 = vmatpush3.bf16.msra.mxu1 %v2390_v48  ;;  %2214 = vmatpush3.bf16.msra.mxu0 %v2391_v49  ;;  %v2427_v48 = vld [vmem:[%s3185_s8 + $0x190] sm:$0xff]   ;;  %v2428_v49 = vld [vmem:[%s3185_s8 + $0x158] sm:$0xff]  }
 0x241   :  { %2193 = vmatprep.subr.bf16.mxu1 %v2392_v50  ;;  %2215 = vmatprep.subr.bf16.mxu0 %v2393_v51  ;;  %v2429_v50 = vld [vmem:[%s3185_s8 + $0x1d8] sm:$0xff]  }
 0x242   :  { %v2430_v51 = vld [vmem:[%s3185_s8 + $0x118] sm:$0xff]  }
 0x244   :  { %2194 = vmatpush3.bf16.msra.mxu1 %v2394_v52  ;;  %2216 = vmatpush3.bf16.msra.mxu0 %v2395_v53  ;;  %v2431_v52 = vld [vmem:[%s3185_s8 + $0x198] sm:$0xff]   ;;  %v2432_v53 = vld [vmem:[%s3185_s8 + $0x160] sm:$0xff]  }
 0x245   :  { %2195 = vmatprep.subr.bf16.mxu1 %v2396_v54  ;;  %2217 = vmatprep.subr.bf16.mxu0 %v2397_v55  ;;  %v2433_v54 = vld [vmem:[%s3185_s8 + $0x1e0] sm:$0xff]  }
 0x246   :  { %v2434_v55 = vld [vmem:[%s3185_s8 + $0x120] sm:$0xff]  }
 0x248   :  { %2196 = vmatpush3.bf16.msra.mxu1 %v2398_v56  ;;  %2218 = vmatpush3.bf16.msra.mxu0 %v2399_v57  ;;  %v2435_v56 = vld [vmem:[%s3185_s8 + $0x1a0] sm:$0xff]   ;;  %v2436_v57 = vld [vmem:[%s3185_s8 + $0x168] sm:$0xff]  }
 0x249   :  { %2197 = vmatprep.subr.bf16.mxu1 %v2400_v58  ;;  %2219 = vmatprep.subr.bf16.mxu0 %v2401_v59  ;;  %v2437_v58 = vld [vmem:[%s3185_s8 + $0x1e8] sm:$0xff]  }
 0x24a   :  { %v2438_v59 = vld [vmem:[%s3185_s8 + $0x128] sm:$0xff]  }
 0x24c   :  { %2198 = vmatpush3.bf16.msra.mxu1 %v2402_v60  ;;  %2220 = vmatpush3.bf16.msra.mxu0 %v2403_v61  ;;  %v2439_v60 = vld [vmem:[%s3185_s8 + $0x1a8] sm:$0xff]   ;;  %v2440_v61 = vld [vmem:[%s3185_s8 + $0x170] sm:$0xff]  }
 0x24d   :  { %2199 = vmatprep.subr.bf16.mxu1 %v2404_v62  ;;  %2221 = vmatprep.subr.bf16.mxu0 %v2405_v63  ;;  %v2441_v62 = vld [vmem:[%s3185_s8 + $0x1f0] sm:$0xff]   ;;  %v692_v63 = vsub.s32 4, %v3042_v13 }
 0x250   :  { %2200 = vmatpush3.bf16.msra.mxu1 %v2406_v0  ;;  %2222 = vmatpush3.bf16.msra.mxu0 %v2407_v4  ;;  %v700_v0 = vsub.s32 6, %v3042_v13  ;;  %v696_v4 = vsub.s32 5, %v3042_v13 }
 0x251   :  { %2201 = vmatprep.subr.bf16.mxu1 %v2408_v2  ;;  %2223 = vmatprep.subr.bf16.mxu0 %v2409_v3  ;;  %v704_v2 = vsub.s32 7, %v3042_v13  ;;  %v2442_v3 = vld [vmem:[%s3185_s8 + $0x130] sm:$0xff]  }
 0x254   :  { %2202 = vmatpush3.bf16.msra.mxu1 %v2410_v5  ;;  %2224 = vmatpush3.bf16.msra.mxu0 %v2411_v6  ;;  %v2443_v5 = vld [vmem:[%s3185_s8 + $0x1b0] sm:$0xff]   ;;  %v693_v6 = vrot.slane %v3049_v16, %v692_v63 }
 0x255   :  { %2203 = vmatprep.subr.bf16.mxu1 %v2412_v7  ;;  %2225 = vmatprep.subr.bf16.mxu0 %v2413_v8  ;;  %v701_v7 = vrot.slane %v3049_v16, %v700_v0  ;;  %v2444_v8 = vld [vmem:[%s3185_s8 + $0x178] sm:$0xff]  }
 0x258   :  { %2204 = vmatpush3.bf16.msra.mxu1 %v2414_v9  ;;  %2226 = vmatpush3.bf16.msra.mxu0 %v2415_v10  ;;  %v2445_v9 = vld [vmem:[%s3185_s8 + $0x1f8] sm:$0xff]   ;;  %v697_v10 = vrot.slane %v3049_v16, %v696_v4 }
 0x259   :  { %2233 = vmatprep.subr.bf16.mxu1 %v2416_v1  ;;  %2255 = vmatprep.subr.bf16.mxu0 %v2417_v11  ;;  %v705_v1 = vrot.slane %v3049_v16, %v704_v2 }
 0x2ee   :  { %v1076_v23 = vpop.f32.mrb[8].mxu1  ;;  %v1117_v24 = vpop.f32.mrb[12].mxu0 }
 0x2ef   :  { %v1077_v25 = vadd.f32 %v1076_v23, %v677_v19  ;;  %v1118_v26 = vadd.f32 %v1117_v24, %v685_v20  ;;  %v1078_v27 = vpop.f32.mrb[9].mxu1  ;;  %v1119_v28 = vpop.f32.mrb[13].mxu0 }
 0x2f0   :  { %v1079_v29 = vadd.f32 %v1078_v27, %v681_v21  ;;  %v1120_v30 = vadd.f32 %v1119_v28, %v689_v22  ;;  %v1080_v31 = vpop.f32.mrb[10].mxu1  ;;  %v1121_v32 = vpop.f32.mrb[14].mxu0 }
 0x2f1   :  { %v1081_v33 = vpop.f32.mrb[11].mxu1  ;;  %v1122_v34 = vpop.f32.mrb[15].mxu0  ;;  %v1206_v39 = vpack.c.bf16 %v1077_v25, %v1077_v25  ;;  %v1208_v40 = vpack.c.bf16 %v1118_v26, %v1118_v26 }
 0x2f2   :  { %v1207_v35 = vpack.c.bf16 %v1079_v29, %v1079_v29  ;;  %v1209_v36 = vpack.c.bf16 %v1120_v30, %v1120_v30  ;;  %v1915_v30 = vld [vmem:[%s3187_s10] sm:$0x3] }
 0x2f3   :  { %1917 = vperm.xlu1 %2342, %v1915_v30   ;;  %v2097_v33 = vld [vmem:[%s3186_s9] ss:$0 sm:$0xff] }
 0x2f4   :  { %1765 = vmatprep.mubr.bf16.mxu1 %v1207_v35  ;;  %1805 = vmatprep.mubr.bf16.mxu0 %v1209_v36 }
 0x2f5   :  { %1766 = vmatmul.mubr.bf16.vlgmr.msra.gmra.mrb[16].mxu1 %v1206_v39  ;;  %1806 = vmatmul.mubr.bf16.vlgmr.msra.gmra.mrb[20].mxu0 %v1208_v40 }
 0x2f6   :  { %2234 = vmatpush3.bf16.msra.mxu1 %v2418_v37  ;;  %2256 = vmatpush3.bf16.msra.mxu0 %v2419_v38 }
 0x2f7   :  { %2235 = vmatprep.subr.bf16.mxu1 %v2420_v41  ;;  %2257 = vmatprep.subr.bf16.mxu0 %v2421_v42 }
 0x2fa   :  { %2236 = vmatpush3.bf16.msra.mxu1 %v2422_v43  ;;  %2258 = vmatpush3.bf16.msra.mxu0 %v2423_v44 }
 0x2fb   :  { %2237 = vmatprep.subr.bf16.mxu1 %v2424_v45  ;;  %2259 = vmatprep.subr.bf16.mxu0 %v2425_v46 }
 0x2fe   :  { %2238 = vmatpush3.bf16.msra.mxu1 %v2426_v47  ;;  %2260 = vmatpush3.bf16.msra.mxu0 %v2427_v48 }
 0x2ff   :  { %2239 = vmatprep.subr.bf16.mxu1 %v2428_v49  ;;  %2261 = vmatprep.subr.bf16.mxu0 %v2429_v50 }
 0x302   :  { %2240 = vmatpush3.bf16.msra.mxu1 %v2430_v51  ;;  %2262 = vmatpush3.bf16.msra.mxu0 %v2431_v52 }
 0x303   :  { %2241 = vmatprep.subr.bf16.mxu1 %v2432_v53  ;;  %2263 = vmatprep.subr.bf16.mxu0 %v2433_v54 }
 0x306   :  { %2242 = vmatpush3.bf16.msra.mxu1 %v2434_v55  ;;  %2264 = vmatpush3.bf16.msra.mxu0 %v2435_v56 }
 0x307   :  { %2243 = vmatprep.subr.bf16.mxu1 %v2436_v57  ;;  %2265 = vmatprep.subr.bf16.mxu0 %v2437_v58 }
 0x30a   :  { %2244 = vmatpush3.bf16.msra.mxu1 %v2438_v59  ;;  %2266 = vmatpush3.bf16.msra.mxu0 %v2439_v60 }
 0x30b   :  { %2245 = vmatprep.subr.bf16.mxu1 %v2440_v61  ;;  %2267 = vmatprep.subr.bf16.mxu0 %v2441_v62  ;;  %v1914_v62 = vand.u32 127, %v674_v12 }
 0x30e   :  { %v1158_v11 = vpop.f32.mrb[12].mxu1  ;;  %v1199_v13 = vpop.f32.mrb[16].mxu0  ;;  %2246 = vmatpush3.bf16.msra.mxu1 %v2442_v3  ;;  %2268 = vmatpush3.bf16.msra.mxu0 %v2443_v5 }
 0x30f   :  { %v1159_v17 = vadd.f32 %v1158_v11, %v693_v6  ;;  %v1200_v18 = vadd.f32 %v1199_v13, %v701_v7  ;;  %v1160_v19 = vpop.f32.mrb[13].mxu1  ;;  %v1201_v20 = vpop.f32.mrb[17].mxu0  ;;  %2247 = vmatprep.subr.bf16.mxu1 %v2444_v8  ;;  %2269 = vmatprep.subr.bf16.mxu0 %v2445_v9 }
 0x310   :  { %v1161_v21 = vadd.f32 %v1160_v19, %v697_v10  ;;  %v1202_v16 = vadd.f32 %v1201_v20, %v705_v1  ;;  %v1162_v22 = vpop.f32.mrb[14].mxu1  ;;  %v1203_v23 = vpop.f32.mrb[18].mxu0 }
 0x311   :  { %v1163_v24 = vpop.f32.mrb[15].mxu1  ;;  %v1204_v25 = vpop.f32.mrb[19].mxu0  ;;  %v1210_v28 = vpack.c.bf16 %v1159_v17, %v1159_v17  ;;  %v1212_v29 = vpack.c.bf16 %v1200_v18, %v1200_v18 }
 0x312   :  { %v1211_v26 = vpack.c.bf16 %v1161_v21, %v1161_v21  ;;  %v1213_v27 = vpack.c.bf16 %v1202_v16, %v1202_v16  ;;  %2248 = vmatpush3.bf16.msra.mxu1 %v2446_v14  ;;  %2270 = vmatpush3.bf16.msra.mxu0 %v2447_v15 }
 0x314   :  { %1845 = vmatprep.mubr.bf16.mxu1 %v1211_v26  ;;  %1885 = vmatprep.mubr.bf16.mxu0 %v1213_v27 }
 0x315   :  { %1846 = vmatmul.mubr.bf16.vlgmr.msra.gmra.mrb[20].mxu1 %v1210_v28  ;;  %1886 = vmatmul.mubr.bf16.vlgmr.msra.gmra.mrb[24].mxu0 %v1212_v29 }
 0x372   :  { %v1918_v61 = vpop.permute.xlu1 %1917 }
 0x373   :  { %vm1919_vm7 = vcmp.eq.s32.totalorder %v1914_v62, %v1918_v61 }
 0x3c8   :  { %v2205_v31 = vpop.f32.mrb[16].mxu1  ;;  %v2227_v32 = vpop.f32.mrb[20].mxu0 }
 0x3c9   :  { %v2206_v34 = vpop.f32.mrb[17].mxu1  ;;  %v2228_v35 = vpop.f32.mrb[21].mxu0 }
 0x3ca   :  { %v2207_v36 = vadd.f32 %v2206_v34, %v2205_v31  ;;  %v2229_v37 = vadd.f32 %v2228_v35, %v2227_v32  ;;  %v2208_v38 = vpop.f32.mrb[18].mxu1  ;;  %v2230_v39 = vpop.f32.mrb[22].mxu0 }
 0x3cb   :  { %v2209_v40 = vpop.f32.mrb[19].mxu1  ;;  %v2231_v41 = vpop.f32.mrb[23].mxu0 }
 0x3cc   :  { %v1768_v42 = vadd.f32 %v2207_v36, %v2097_v33 }
 0x3ce   :  { %v1808_v43 = vadd.f32 %v2229_v37, %v1768_v42 }
 0x3e8   :  { %v2249_v44 = vpop.f32.mrb[20].mxu1  ;;  %v2271_v45 = vpop.f32.mrb[24].mxu0 }
 0x3e9   :  { %v2250_v46 = vpop.f32.mrb[21].mxu1  ;;  %v2272_v47 = vpop.f32.mrb[25].mxu0 }
 0x3ea   :  { %v2251_v48 = vadd.f32 %v2250_v46, %v2249_v44  ;;  %v2273_v49 = vadd.f32 %v2272_v47, %v2271_v45  ;;  %v2252_v50 = vpop.f32.mrb[22].mxu1  ;;  %v2274_v51 = vpop.f32.mrb[26].mxu0 }
 0x3eb   :  { %v2253_v52 = vpop.f32.mrb[23].mxu1  ;;  %v2275_v53 = vpop.f32.mrb[27].mxu0 }
 0x3ec   :  { %v1848_v54 = vadd.f32 %v2251_v48, %v1808_v43 }
 0x3ee   :  { %v1888_v55 = vadd.f32 %v2273_v49, %v1848_v54 }
 0x3f0   :  { %1894 = vst.msk [vmem:[%s3188_s11] sm:$0x3] %vm1893_vm5, %v1888_v55  ;;  %1921 = vrot.lane.b32.xlu1 %v1888_v55, %s2479_s29  ;;  %v1896_v56 = vsel %vm1895_vm6, %v1888_v55, -inf  ;;  %s2480_s11 = smov [#allocation2]  }
 0x3f1   :  { %1897 = vmax.xlane.f32.xlu0 %v1896_v56  ;;  %s1947_s30 = sshll.u32 %s2480_s11, 4  ;;  %s1948_s30 = int_to_ptr.vmem [resolvable:$true] %s1947_s30 }
 0x3f2   :  { %s2452_s13 = scalar_lea.vmem %s1948_s30, 16  ;;  %s2456_s14 = scalar_lea.vmem %s1948_s30, 32 }
 0x3f3   :  { %p2453_p0 = scmp.ne.s32.totalorder %s1948_s30, %s2452_s13  ;;  %p2457_p1 = scmp.lt.s32.totalorder %s1948_s30, %s1948_s30 }
 0x3f4   :  { %p2458_p2 = scmp.lt.s32.totalorder %s2456_s14, %s2452_s13 }
 0x3f6   :  { %p2459_p3 = por %p2458_p2, %p2457_p1 }
 0x3f8   :  { %p2460_p4 = pnand %p2459_p3, %p2453_p0 }
 0x462   :  { %v1922_v63 = vpop.permute.xlu1 %1921 }
 0x463   :  { %v1924_v0 = vsel %vm1919_vm7, %v1922_v63, 0.0 }
 0x464   :  { %v1925_v4 = vsel %vm1906_vm8, %v1924_v0, 0.0 }
 0x47e   :  { %v1898_v57 = vpop.xlane.xlu0 %1897 }
 0x47f   :  { %v1899_v58 = vsub.f32 %v1888_v55, %v1898_v57 }
 0x481   :  { %v1900_v59 = vmul.f32 1.442695, %v1899_v58 }
 0x483   :  { %2448 = vpow2.f32 %v1900_v59 }
 0x48d   :  { %v2449_v60 = vpop.eup %2448 }
 0x48e   :  { %1903 = vrot.lane.b32.xlu0 %v2449_v60, %s2479_s29 }
 0x4ad   :  { %1926 = vadd.xlane.f32.xlu0 %v1925_v4 }
 0x500   :  { %v1904_v2 = vpop.permute.xlu0 %1903 }
 0x501   :  { %v1907_v3 = vsel %vm1906_vm8, %v1904_v2, 0.0 }
 0x502   :  { %1908 = vadd.xlane.f32.xlu1 %v1907_v3 }
 0x53a   :  { %v1927_v9 = vpop.xlane.xlu0 %1926 }
 0x58f   :  { %v1909_v5 = vpop.xlane.xlu1 %1908 }
 0x590   :  { %2450 = vlog2.f32 %v1909_v5 }
 0x59a   :  { %v2451_v6 = vpop.eup %2450 }
 0x59b   :  { %v1911_v7 = vmul.f32 0.6931472, %v2451_v6 }
 0x59d   :  { %v1912_v8 = vadd.f32 %v1911_v7, %v1898_v57 }
 0x59f   :  { %v1928_v10 = vsub.f32 %v1912_v8, %v1927_v9 }
 0x5a1   :  { %v1930_v1 = vsel %vm1929_vm9, %v1928_v10, 0.0 }
 0x5a2   :  { %v1931_v11 = vrot.slane %v1930_v1, 4 }
 0x5a4   :  { %v1932_v12 = vadd.f32 %v1931_v11, %v1930_v1 }
 0x5a6   :  { %v1933_v13 = vrot.slane %v1932_v12, 2 }
 0x5a8   :  { %v1934_v14 = vadd.f32 %v1933_v13, %v1932_v12 }
 0x5aa   :  { %v1935_v15 = vrot.slane %v1934_v14, 1 }
 0x5ac   :  { %v1936_v17 = vadd.f32 %v1935_v15, %v1934_v14 }
 0x5ae   :  { %1938 = vst.msk [vmem:[#allocation2] sm:$0x1] %vm1937_vm10, %v1936_v17 }
 0x5af   :  { %2463 = shalt.err (!%p2460_p4)
}
 0x5b0   :  { %s2464_s16 = scalar_lea.hbm %s3189_s12, 16 }
 0x5b1   :  { %p2465_p5 = scmp.ne.s32.totalorder %s3189_s12, %s2464_s16  ;;  %p2468_p6 = scmp.lt.u32.totalorder %s2464_s16, %s3189_s12 }
 0x5b3   :  { %p2470_p7 = pnand %p2468_p6, %p2465_p5 }
 0x5b5   :  { %2473 = shalt.err (!%p2470_p7)
}
 0x5b6   :  { %1950 = dma.vmem_to_hbm [thread:$0]  %s1948_s30, 16, %s3189_s12, [#allocation3]  }
 0x5b7   :  { %2474 = dma.done.wait [#allocation3], 16  }
 0x5b8   :  { %2475 = vsyncadd [#allocation3], 4294967280 }
 0x5b9   :  { %1956 = vsyncpa [#allocation3], 1 }

</bundles_post_ra>
